<compile_context>
chip_gen: v7x
topology: tpu7x:2x2x1
jax: 0.10.0
libtpu: 0.0.40
codegen_flags: <defaults>
</compile_context>

<pallas_src>
import functools

import jax
import jax.numpy as jnp
from jax import lax
from jax.experimental import pallas as pl
from jax.experimental.pallas import tpu as pltpu  # noqa: F401  (TPU backend assumed)


# ------------------------- fused Discriminator kernel -------------------------

def _disc_fused_kernel(*refs, num_layers, num_heads, f_out):
    feat_ref, adj_ref = refs[0], refs[1]
    layer_refs = refs[2:2 + 4 * num_layers]
    w1_ref, b1_ref, w2_ref, b2_ref = refs[2 + 4 * num_layers:6 + 4 * num_layers]
    hidden_ref, out_ref = refs[6 + 4 * num_layers], refs[7 + 4 * num_layers]

    # adjacency: adj[dst, src] != 0 iff edge src -> dst (stored as int8, loaded once)
    mask = adj_ref[...].astype(jnp.float32) > 0.0
    neg_inf = jnp.float32(-1e30)

    h_cur = feat_ref[...].astype(jnp.float32)                              # (N, d_in)
    for l in range(num_layers):                                            # static unroll
        w_ref, al_ref, ar_ref, b_ref = layer_refs[4 * l:4 * l + 4]
        # projection, lane-dense (N, H*F): head h occupies lanes [h*F, (h+1)*F)
        z = jnp.dot(h_cur, w_ref[...], preferred_element_type=jnp.float32)
        al = al_ref[...]                                                   # (1, H*F)
        ar = ar_ref[...]                                                   # (1, H*F)
        bias = b_ref[...]                                                  # (1, H*F)

        head_outs = []
        for hd in range(num_heads):                                        # static unroll
            lo = hd * f_out
            z_h = z[:, lo:lo + f_out]                                      # (N, F)
            # er[dst] = <z[dst], attn_r>,  el[src] = <z[src], attn_l>
            er = jnp.sum(z_h * ar[:, lo:lo + f_out], axis=-1, keepdims=True)      # (N, 1)
            el = lax.dot_general(al[:, lo:lo + f_out], z_h,
                                 (((1,), (1,)), ((), ())),
                                 preferred_element_type=jnp.float32)              # (1, N)
            s = er + el                                                    # (N, N) logits
            s = jnp.where(s >= 0.0, s, 0.2 * s)                            # LeakyReLU(0.2)
            s = jnp.where(mask, s, neg_inf)
            m = jnp.max(s, axis=-1, keepdims=True)
            e = jnp.where(mask, jnp.exp(s - m), 0.0)
            denom = jnp.sum(e, axis=-1, keepdims=True)
            alpha = e * pl.reciprocal(jnp.maximum(denom, 1e-30), approx=True)
            o_h = jnp.dot(alpha, z_h, preferred_element_type=jnp.float32)  # (N, F)
            head_outs.append(jax.nn.sigmoid(o_h + bias[:, lo:lo + f_out]))
        h_cur = jnp.concatenate(head_outs, axis=-1)                        # (N, H*F)

    hidden_ref[...] = h_cur.astype(hidden_ref.dtype)

    # fc: Linear(H*F,10) -> ReLU -> Linear(10,1); (N,10) intermediate stays on-chip
    y1 = jnp.dot(h_cur, w1_ref[...], preferred_element_type=jnp.float32) + b1_ref[...]
    y1 = jnp.maximum(y1, 0.0)
    y2 = jnp.dot(y1, w2_ref[...], preferred_element_type=jnp.float32) + b2_ref[...]
    out_ref[...] = y2.astype(out_ref.dtype)


# ------------------------- params & wrapper -------------------------

def init_discriminator_params(key, f_in, f_out, num_heads, num_layers):
    params = {"gat": [], "fc": {}}
    cur_in = f_in
    for _ in range(num_layers):
        key, k1, k2, k3 = jax.random.split(key, 4)
        params["gat"].append({
            "w": 0.1 * jax.random.normal(k1, (cur_in, num_heads * f_out), jnp.float32),
            "attn_l": 0.1 * jax.random.normal(k2, (num_heads, f_out), jnp.float32),
            "attn_r": 0.1 * jax.random.normal(k3, (num_heads, f_out), jnp.float32),
            "bias": jnp.zeros((num_heads * f_out,), jnp.float32),
        })
        cur_in = f_out * num_heads
    key, k1, k2 = jax.random.split(key, 3)
    params["fc"] = {
        "w1": 0.1 * jax.random.normal(k1, (f_out * num_heads, 10), jnp.float32),
        "b1": jnp.zeros((10,), jnp.float32),
        "w2": 0.1 * jax.random.normal(k2, (10, 1), jnp.float32),
        "b2": jnp.zeros((1,), jnp.float32),
    }
    return params


def discriminator_forward(params, adj, features):
    n = features.shape[0]
    num_layers = len(params["gat"])
    num_heads, f_out = params["gat"][0]["attn_l"].shape
    hf = num_heads * f_out

    adj_i8 = (adj != 0).astype(jnp.int8)                       # mask only; int8 saves BW

    inputs = [features.astype(jnp.float32), adj_i8]
    for layer in params["gat"]:
        inputs += [layer["w"],
                   layer["attn_l"].reshape(1, hf),             # lane-dense per-head params
                   layer["attn_r"].reshape(1, hf),
                   layer["bias"].reshape(1, hf)]
    fc = params["fc"]
    inputs += [fc["w1"], fc["b1"].reshape(1, -1), fc["w2"], fc["b2"].reshape(1, 1)]

    kern = functools.partial(_disc_fused_kernel, num_layers=num_layers,
                             num_heads=num_heads, f_out=f_out)
    hidden, out = pl.pallas_call(
        kern,
        out_shape=(jax.ShapeDtypeStruct((n, hf), jnp.float32),   # hidden features
                   jax.ShapeDtypeStruct((n, 1), jnp.float32)),   # fc output
    )(*inputs)
    return jnp.squeeze(out, axis=-1), hidden


# ------------------------- demo -------------------------

if __name__ == "__main__":
    N, F_IN, F_OUT, HEADS, LAYERS = 16, 8, 4, 2, 2
    key = jax.random.PRNGKey(0)
    key, kf, ka = jax.random.split(key, 3)

    features = jax.random.normal(kf, (N, F_IN), jnp.float32)
    # random directed graph with self-loops so every node has >= 1 in-edge
    adj = (jax.random.uniform(ka, (N, N)) < 0.3).astype(jnp.float32)
    adj = jnp.maximum(adj, jnp.eye(N, dtype=jnp.float32))

    params = init_discriminator_params(key, F_IN, F_OUT, HEADS, LAYERS)

    output, hidden = discriminator_forward(params, adj, features)
    jax.block_until_ready((output, hidden))

    assert output.shape == (N,)
    assert hidden.shape == (N, F_OUT * HEADS)
    assert bool(jnp.all(jnp.isfinite(output))) and bool(jnp.all(jnp.isfinite(hidden)))
    print("KERNEL_OK")
</pallas_src>

<mosaic_0001>
module attributes {stable_mosaic.version = 11 : i64} {
  func.func @_disc_fused_kernel(%arg0: memref<16x8xf32, #tpu.memory_space<vmem>>, %arg1: memref<16x16xi8, #tpu.memory_space<vmem>>, %arg2: memref<8x8xf32, #tpu.memory_space<vmem>>, %arg3: memref<1x8xf32, #tpu.memory_space<vmem>>, %arg4: memref<1x8xf32, #tpu.memory_space<vmem>>, %arg5: memref<1x8xf32, #tpu.memory_space<vmem>>, %arg6: memref<8x8xf32, #tpu.memory_space<vmem>>, %arg7: memref<1x8xf32, #tpu.memory_space<vmem>>, %arg8: memref<1x8xf32, #tpu.memory_space<vmem>>, %arg9: memref<1x8xf32, #tpu.memory_space<vmem>>, %arg10: memref<8x10xf32, #tpu.memory_space<vmem>>, %arg11: memref<1x10xf32, #tpu.memory_space<vmem>>, %arg12: memref<10x1xf32, #tpu.memory_space<vmem>>, %arg13: memref<1x1xf32, #tpu.memory_space<vmem>>, %arg14: memref<16x8xf32, #tpu.memory_space<vmem>>, %arg15: memref<16x1xf32, #tpu.memory_space<vmem>>) attributes {dimension_semantics = [], scalar_prefetch = 0 : i64, scratch_operands = 0 : i64, tpu.core_type = #tpu.core_type<tc>} {
    %c0 = arith.constant 0 : index
    %c0_0 = arith.constant 0 : index
    %0 = vector.load %arg1[%c0, %c0_0] : memref<16x16xi8, #tpu.memory_space<vmem>>, vector<16x16xi8>
    %1 = arith.sitofp %0 : vector<16x16xi8> to vector<16x16xf32>
    %cst = arith.constant 0.000000e+00 : f32
    %2 = vector.broadcast %cst : f32 to vector<16x16xf32>
    %3 = arith.cmpf ogt, %1, %2 : vector<16x16xf32>
    %c0_1 = arith.constant 0 : index
    %c0_2 = arith.constant 0 : index
    %4 = vector.load %arg0[%c0_1, %c0_2] : memref<16x8xf32, #tpu.memory_space<vmem>>, vector<16x8xf32>
    %c0_3 = arith.constant 0 : index
    %c0_4 = arith.constant 0 : index
    %5 = vector.load %arg2[%c0_3, %c0_4] : memref<8x8xf32, #tpu.memory_space<vmem>>, vector<8x8xf32>
    %cst_5 = arith.constant dense<0.000000e+00> : vector<16x8xf32>
    %6 = tpu.matmul %4, %5, %cst_5 {dimension_numbers = #tpu.dot_dimension_numbers<[1], [0], [0], [1], [0, 0, 1, 1], [], []>} : vector<16x8xf32>, vector<8x8xf32>, vector<16x8xf32> -> vector<16x8xf32>
    %c0_6 = arith.constant 0 : index
    %c0_7 = arith.constant 0 : index
    %7 = vector.load %arg3[%c0_6, %c0_7] : memref<1x8xf32, #tpu.memory_space<vmem>>, vector<1x8xf32>
    %c0_8 = arith.constant 0 : index
    %c0_9 = arith.constant 0 : index
    %8 = vector.load %arg4[%c0_8, %c0_9] : memref<1x8xf32, #tpu.memory_space<vmem>>, vector<1x8xf32>
    %c0_10 = arith.constant 0 : index
    %c0_11 = arith.constant 0 : index
    %9 = vector.load %arg5[%c0_10, %c0_11] : memref<1x8xf32, #tpu.memory_space<vmem>>, vector<1x8xf32>
    %10 = vector.extract_strided_slice %6 {offsets = [0, 0], sizes = [16, 4], strides = [1, 1]} : vector<16x8xf32> to vector<16x4xf32>
    %11 = vector.extract_strided_slice %8 {offsets = [0, 0], sizes = [1, 4], strides = [1, 1]} : vector<1x8xf32> to vector<1x4xf32>
    %12 = vector.broadcast %11 : vector<1x4xf32> to vector<16x4xf32>
    %13 = arith.mulf %10, %12 : vector<16x4xf32>
    %cst_12 = arith.constant dense<0.000000e+00> : vector<16xf32>
    %14 = vector.multi_reduction <add>, %13, %cst_12 [1] : vector<16x4xf32> to vector<16xf32>
    %15 = vector.shape_cast %14 : vector<16xf32> to vector<16x1xf32>
    %16 = vector.extract_strided_slice %7 {offsets = [0, 0], sizes = [1, 4], strides = [1, 1]} : vector<1x8xf32> to vector<1x4xf32>
    %cst_13 = arith.constant dense<0.000000e+00> : vector<1x16xf32>
    %17 = tpu.matmul %16, %10, %cst_13 {dimension_numbers = #tpu.dot_dimension_numbers<[1], [1], [0], [0], [0, 0, 1, 0], [], []>} : vector<1x4xf32>, vector<16x4xf32>, vector<1x16xf32> -> vector<1x16xf32>
    %18 = vector.broadcast %15 : vector<16x1xf32> to vector<16x16xf32>
    %19 = vector.broadcast %17 : vector<1x16xf32> to vector<16x16xf32>
    %20 = arith.addf %18, %19 : vector<16x16xf32>
    %cst_14 = arith.constant 0.000000e+00 : f32
    %21 = vector.broadcast %cst_14 : f32 to vector<16x16xf32>
    %22 = arith.cmpf oge, %20, %21 : vector<16x16xf32>
    %cst_15 = arith.constant 2.000000e-01 : f32
    %23 = vector.broadcast %cst_15 : f32 to vector<16x16xf32>
    %24 = arith.mulf %23, %20 : vector<16x16xf32>
    %25 = arith.select %22, %20, %24 : vector<16x16xi1>, vector<16x16xf32>
    %cst_16 = arith.constant -1.000000e+30 : f32
    %26 = vector.broadcast %cst_16 : f32 to vector<16x16xf32>
    %27 = arith.select %3, %25, %26 : vector<16x16xi1>, vector<16x16xf32>
    %cst_17 = arith.constant dense<0xFF800000> : vector<16xf32>
    %28 = vector.multi_reduction <maximumf>, %27, %cst_17 [1] : vector<16x16xf32> to vector<16xf32>
    %29 = vector.shape_cast %28 : vector<16xf32> to vector<16x1xf32>
    %30 = vector.broadcast %29 : vector<16x1xf32> to vector<16x16xf32>
    %31 = arith.subf %27, %30 : vector<16x16xf32>
    %32 = math.exp %31 : vector<16x16xf32>
    %cst_18 = arith.constant 0.000000e+00 : f32
    %33 = vector.broadcast %cst_18 : f32 to vector<16x16xf32>
    %34 = arith.select %3, %32, %33 : vector<16x16xi1>, vector<16x16xf32>
    %cst_19 = arith.constant dense<0.000000e+00> : vector<16xf32>
    %35 = vector.multi_reduction <add>, %34, %cst_19 [1] : vector<16x16xf32> to vector<16xf32>
    %36 = vector.shape_cast %35 : vector<16xf32> to vector<16x1xf32>
    %cst_20 = arith.constant 1.000000e-30 : f32
    %37 = vector.broadcast %cst_20 : f32 to vector<16x1xf32>
    %38 = arith.maximumf %36, %37 : vector<16x1xf32>
    %39 = tpu.reciprocal %38 {approx = true} : vector<16x1xf32> -> vector<16x1xf32>
    %40 = vector.broadcast %39 : vector<16x1xf32> to vector<16x16xf32>
    %41 = arith.mulf %34, %40 : vector<16x16xf32>
    %cst_21 = arith.constant dense<0.000000e+00> : vector<16x4xf32>
    %42 = tpu.matmul %41, %10, %cst_21 {dimension_numbers = #tpu.dot_dimension_numbers<[1], [0], [0], [1], [0, 0, 1, 1], [], []>} : vector<16x16xf32>, vector<16x4xf32>, vector<16x4xf32> -> vector<16x4xf32>
    %43 = vector.extract_strided_slice %9 {offsets = [0, 0], sizes = [1, 4], strides = [1, 1]} : vector<1x8xf32> to vector<1x4xf32>
    %44 = vector.broadcast %43 : vector<1x4xf32> to vector<16x4xf32>
    %45 = arith.addf %42, %44 : vector<16x4xf32>
    %46 = arith.negf %45 : vector<16x4xf32>
    %47 = math.exp %46 : vector<16x4xf32>
    %cst_22 = arith.constant 1.000000e+00 : f32
    %48 = vector.broadcast %cst_22 : f32 to vector<16x4xf32>
    %49 = arith.addf %48, %47 : vector<16x4xf32>
    %50 = arith.divf %48, %49 : vector<16x4xf32>
    %51 = vector.extract_strided_slice %6 {offsets = [0, 4], sizes = [16, 4], strides = [1, 1]} : vector<16x8xf32> to vector<16x4xf32>
    %52 = vector.extract_strided_slice %8 {offsets = [0, 4], sizes = [1, 4], strides = [1, 1]} : vector<1x8xf32> to vector<1x4xf32>
    %53 = vector.broadcast %52 : vector<1x4xf32> to vector<16x4xf32>
    %54 = arith.mulf %51, %53 : vector<16x4xf32>
    %cst_23 = arith.constant dense<0.000000e+00> : vector<16xf32>
    %55 = vector.multi_reduction <add>, %54, %cst_23 [1] : vector<16x4xf32> to vector<16xf32>
    %56 = vector.shape_cast %55 : vector<16xf32> to vector<16x1xf32>
    %57 = vector.extract_strided_slice %7 {offsets = [0, 4], sizes = [1, 4], strides = [1, 1]} : vector<1x8xf32> to vector<1x4xf32>
    %cst_24 = arith.constant dense<0.000000e+00> : vector<1x16xf32>
    %58 = tpu.matmul %57, %51, %cst_24 {dimension_numbers = #tpu.dot_dimension_numbers<[1], [1], [0], [0], [0, 0, 1, 0], [], []>} : vector<1x4xf32>, vector<16x4xf32>, vector<1x16xf32> -> vector<1x16xf32>
    %59 = vector.broadcast %56 : vector<16x1xf32> to vector<16x16xf32>
    %60 = vector.broadcast %58 : vector<1x16xf32> to vector<16x16xf32>
    %61 = arith.addf %59, %60 : vector<16x16xf32>
    %cst_25 = arith.constant 0.000000e+00 : f32
    %62 = vector.broadcast %cst_25 : f32 to vector<16x16xf32>
    %63 = arith.cmpf oge, %61, %62 : vector<16x16xf32>
    %cst_26 = arith.constant 2.000000e-01 : f32
    %64 = vector.broadcast %cst_26 : f32 to vector<16x16xf32>
    %65 = arith.mulf %64, %61 : vector<16x16xf32>
    %66 = arith.select %63, %61, %65 : vector<16x16xi1>, vector<16x16xf32>
    %cst_27 = arith.constant -1.000000e+30 : f32
    %67 = vector.broadcast %cst_27 : f32 to vector<16x16xf32>
    %68 = arith.select %3, %66, %67 : vector<16x16xi1>, vector<16x16xf32>
    %cst_28 = arith.constant dense<0xFF800000> : vector<16xf32>
    %69 = vector.multi_reduction <maximumf>, %68, %cst_28 [1] : vector<16x16xf32> to vector<16xf32>
    %70 = vector.shape_cast %69 : vector<16xf32> to vector<16x1xf32>
    %71 = vector.broadcast %70 : vector<16x1xf32> to vector<16x16xf32>
    %72 = arith.subf %68, %71 : vector<16x16xf32>
    %73 = math.exp %72 : vector<16x16xf32>
    %cst_29 = arith.constant 0.000000e+00 : f32
    %74 = vector.broadcast %cst_29 : f32 to vector<16x16xf32>
    %75 = arith.select %3, %73, %74 : vector<16x16xi1>, vector<16x16xf32>
    %cst_30 = arith.constant dense<0.000000e+00> : vector<16xf32>
    %76 = vector.multi_reduction <add>, %75, %cst_30 [1] : vector<16x16xf32> to vector<16xf32>
    %77 = vector.shape_cast %76 : vector<16xf32> to vector<16x1xf32>
    %cst_31 = arith.constant 1.000000e-30 : f32
    %78 = vector.broadcast %cst_31 : f32 to vector<16x1xf32>
    %79 = arith.maximumf %77, %78 : vector<16x1xf32>
    %80 = tpu.reciprocal %79 {approx = true} : vector<16x1xf32> -> vector<16x1xf32>
    %81 = vector.broadcast %80 : vector<16x1xf32> to vector<16x16xf32>
    %82 = arith.mulf %75, %81 : vector<16x16xf32>
    %cst_32 = arith.constant dense<0.000000e+00> : vector<16x4xf32>
    %83 = tpu.matmul %82, %51, %cst_32 {dimension_numbers = #tpu.dot_dimension_numbers<[1], [0], [0], [1], [0, 0, 1, 1], [], []>} : vector<16x16xf32>, vector<16x4xf32>, vector<16x4xf32> -> vector<16x4xf32>
    %84 = vector.extract_strided_slice %9 {offsets = [0, 4], sizes = [1, 4], strides = [1, 1]} : vector<1x8xf32> to vector<1x4xf32>
    %85 = vector.broadcast %84 : vector<1x4xf32> to vector<16x4xf32>
    %86 = arith.addf %83, %85 : vector<16x4xf32>
    %87 = arith.negf %86 : vector<16x4xf32>
    %88 = math.exp %87 : vector<16x4xf32>
    %cst_33 = arith.constant 1.000000e+00 : f32
    %89 = vector.broadcast %cst_33 : f32 to vector<16x4xf32>
    %90 = arith.addf %89, %88 : vector<16x4xf32>
    %91 = arith.divf %89, %90 : vector<16x4xf32>
    %92 = tpu.concatenate %50, %91 in 1 : vector<16x4xf32>, vector<16x4xf32> -> vector<16x8xf32>
    %c0_34 = arith.constant 0 : index
    %c0_35 = arith.constant 0 : index
    %93 = vector.load %arg6[%c0_34, %c0_35] : memref<8x8xf32, #tpu.memory_space<vmem>>, vector<8x8xf32>
    %cst_36 = arith.constant dense<0.000000e+00> : vector<16x8xf32>
    %94 = tpu.matmul %92, %93, %cst_36 {dimension_numbers = #tpu.dot_dimension_numbers<[1], [0], [0], [1], [0, 0, 1, 1], [], []>} : vector<16x8xf32>, vector<8x8xf32>, vector<16x8xf32> -> vector<16x8xf32>
    %c0_37 = arith.constant 0 : index
    %c0_38 = arith.constant 0 : index
    %95 = vector.load %arg7[%c0_37, %c0_38] : memref<1x8xf32, #tpu.memory_space<vmem>>, vector<1x8xf32>
    %c0_39 = arith.constant 0 : index
    %c0_40 = arith.constant 0 : index
    %96 = vector.load %arg8[%c0_39, %c0_40] : memref<1x8xf32, #tpu.memory_space<vmem>>, vector<1x8xf32>
    %c0_41 = arith.constant 0 : index
    %c0_42 = arith.constant 0 : index
    %97 = vector.load %arg9[%c0_41, %c0_42] : memref<1x8xf32, #tpu.memory_space<vmem>>, vector<1x8xf32>
    %98 = vector.extract_strided_slice %94 {offsets = [0, 0], sizes = [16, 4], strides = [1, 1]} : vector<16x8xf32> to vector<16x4xf32>
    %99 = vector.extract_strided_slice %96 {offsets = [0, 0], sizes = [1, 4], strides = [1, 1]} : vector<1x8xf32> to vector<1x4xf32>
    %100 = vector.broadcast %99 : vector<1x4xf32> to vector<16x4xf32>
    %101 = arith.mulf %98, %100 : vector<16x4xf32>
    %cst_43 = arith.constant dense<0.000000e+00> : vector<16xf32>
    %102 = vector.multi_reduction <add>, %101, %cst_43 [1] : vector<16x4xf32> to vector<16xf32>
    %103 = vector.shape_cast %102 : vector<16xf32> to vector<16x1xf32>
    %104 = vector.extract_strided_slice %95 {offsets = [0, 0], sizes = [1, 4], strides = [1, 1]} : vector<1x8xf32> to vector<1x4xf32>
    %cst_44 = arith.constant dense<0.000000e+00> : vector<1x16xf32>
    %105 = tpu.matmul %104, %98, %cst_44 {dimension_numbers = #tpu.dot_dimension_numbers<[1], [1], [0], [0], [0, 0, 1, 0], [], []>} : vector<1x4xf32>, vector<16x4xf32>, vector<1x16xf32> -> vector<1x16xf32>
    %106 = vector.broadcast %103 : vector<16x1xf32> to vector<16x16xf32>
    %107 = vector.broadcast %105 : vector<1x16xf32> to vector<16x16xf32>
    %108 = arith.addf %106, %107 : vector<16x16xf32>
    %cst_45 = arith.constant 0.000000e+00 : f32
    %109 = vector.broadcast %cst_45 : f32 to vector<16x16xf32>
    %110 = arith.cmpf oge, %108, %109 : vector<16x16xf32>
    %cst_46 = arith.constant 2.000000e-01 : f32
    %111 = vector.broadcast %cst_46 : f32 to vector<16x16xf32>
    %112 = arith.mulf %111, %108 : vector<16x16xf32>
    %113 = arith.select %110, %108, %112 : vector<16x16xi1>, vector<16x16xf32>
    %cst_47 = arith.constant -1.000000e+30 : f32
    %114 = vector.broadcast %cst_47 : f32 to vector<16x16xf32>
    %115 = arith.select %3, %113, %114 : vector<16x16xi1>, vector<16x16xf32>
    %cst_48 = arith.constant dense<0xFF800000> : vector<16xf32>
    %116 = vector.multi_reduction <maximumf>, %115, %cst_48 [1] : vector<16x16xf32> to vector<16xf32>
    %117 = vector.shape_cast %116 : vector<16xf32> to vector<16x1xf32>
    %118 = vector.broadcast %117 : vector<16x1xf32> to vector<16x16xf32>
    %119 = arith.subf %115, %118 : vector<16x16xf32>
    %120 = math.exp %119 : vector<16x16xf32>
    %cst_49 = arith.constant 0.000000e+00 : f32
    %121 = vector.broadcast %cst_49 : f32 to vector<16x16xf32>
    %122 = arith.select %3, %120, %121 : vector<16x16xi1>, vector<16x16xf32>
    %cst_50 = arith.constant dense<0.000000e+00> : vector<16xf32>
    %123 = vector.multi_reduction <add>, %122, %cst_50 [1] : vector<16x16xf32> to vector<16xf32>
    %124 = vector.shape_cast %123 : vector<16xf32> to vector<16x1xf32>
    %cst_51 = arith.constant 1.000000e-30 : f32
    %125 = vector.broadcast %cst_51 : f32 to vector<16x1xf32>
    %126 = arith.maximumf %124, %125 : vector<16x1xf32>
    %127 = tpu.reciprocal %126 {approx = true} : vector<16x1xf32> -> vector<16x1xf32>
    %128 = vector.broadcast %127 : vector<16x1xf32> to vector<16x16xf32>
    %129 = arith.mulf %122, %128 : vector<16x16xf32>
    %cst_52 = arith.constant dense<0.000000e+00> : vector<16x4xf32>
    %130 = tpu.matmul %129, %98, %cst_52 {dimension_numbers = #tpu.dot_dimension_numbers<[1], [0], [0], [1], [0, 0, 1, 1], [], []>} : vector<16x16xf32>, vector<16x4xf32>, vector<16x4xf32> -> vector<16x4xf32>
    %131 = vector.extract_strided_slice %97 {offsets = [0, 0], sizes = [1, 4], strides = [1, 1]} : vector<1x8xf32> to vector<1x4xf32>
    %132 = vector.broadcast %131 : vector<1x4xf32> to vector<16x4xf32>
    %133 = arith.addf %130, %132 : vector<16x4xf32>
    %134 = arith.negf %133 : vector<16x4xf32>
    %135 = math.exp %134 : vector<16x4xf32>
    %cst_53 = arith.constant 1.000000e+00 : f32
    %136 = vector.broadcast %cst_53 : f32 to vector<16x4xf32>
    %137 = arith.addf %136, %135 : vector<16x4xf32>
    %138 = arith.divf %136, %137 : vector<16x4xf32>
    %139 = vector.extract_strided_slice %94 {offsets = [0, 4], sizes = [16, 4], strides = [1, 1]} : vector<16x8xf32> to vector<16x4xf32>
    %140 = vector.extract_strided_slice %96 {offsets = [0, 4], sizes = [1, 4], strides = [1, 1]} : vector<1x8xf32> to vector<1x4xf32>
    %141 = vector.broadcast %140 : vector<1x4xf32> to vector<16x4xf32>
    %142 = arith.mulf %139, %141 : vector<16x4xf32>
    %cst_54 = arith.constant dense<0.000000e+00> : vector<16xf32>
    %143 = vector.multi_reduction <add>, %142, %cst_54 [1] : vector<16x4xf32> to vector<16xf32>
    %144 = vector.shape_cast %143 : vector<16xf32> to vector<16x1xf32>
    %145 = vector.extract_strided_slice %95 {offsets = [0, 4], sizes = [1, 4], strides = [1, 1]} : vector<1x8xf32> to vector<1x4xf32>
    %cst_55 = arith.constant dense<0.000000e+00> : vector<1x16xf32>
    %146 = tpu.matmul %145, %139, %cst_55 {dimension_numbers = #tpu.dot_dimension_numbers<[1], [1], [0], [0], [0, 0, 1, 0], [], []>} : vector<1x4xf32>, vector<16x4xf32>, vector<1x16xf32> -> vector<1x16xf32>
    %147 = vector.broadcast %144 : vector<16x1xf32> to vector<16x16xf32>
    %148 = vector.broadcast %146 : vector<1x16xf32> to vector<16x16xf32>
    %149 = arith.addf %147, %148 : vector<16x16xf32>
    %cst_56 = arith.constant 0.000000e+00 : f32
    %150 = vector.broadcast %cst_56 : f32 to vector<16x16xf32>
    %151 = arith.cmpf oge, %149, %150 : vector<16x16xf32>
    %cst_57 = arith.constant 2.000000e-01 : f32
    %152 = vector.broadcast %cst_57 : f32 to vector<16x16xf32>
    %153 = arith.mulf %152, %149 : vector<16x16xf32>
    %154 = arith.select %151, %149, %153 : vector<16x16xi1>, vector<16x16xf32>
    %cst_58 = arith.constant -1.000000e+30 : f32
    %155 = vector.broadcast %cst_58 : f32 to vector<16x16xf32>
    %156 = arith.select %3, %154, %155 : vector<16x16xi1>, vector<16x16xf32>
    %cst_59 = arith.constant dense<0xFF800000> : vector<16xf32>
    %157 = vector.multi_reduction <maximumf>, %156, %cst_59 [1] : vector<16x16xf32> to vector<16xf32>
    %158 = vector.shape_cast %157 : vector<16xf32> to vector<16x1xf32>
    %159 = vector.broadcast %158 : vector<16x1xf32> to vector<16x16xf32>
    %160 = arith.subf %156, %159 : vector<16x16xf32>
    %161 = math.exp %160 : vector<16x16xf32>
    %cst_60 = arith.constant 0.000000e+00 : f32
    %162 = vector.broadcast %cst_60 : f32 to vector<16x16xf32>
    %163 = arith.select %3, %161, %162 : vector<16x16xi1>, vector<16x16xf32>
    %cst_61 = arith.constant dense<0.000000e+00> : vector<16xf32>
    %164 = vector.multi_reduction <add>, %163, %cst_61 [1] : vector<16x16xf32> to vector<16xf32>
    %165 = vector.shape_cast %164 : vector<16xf32> to vector<16x1xf32>
    %cst_62 = arith.constant 1.000000e-30 : f32
    %166 = vector.broadcast %cst_62 : f32 to vector<16x1xf32>
    %167 = arith.maximumf %165, %166 : vector<16x1xf32>
    %168 = tpu.reciprocal %167 {approx = true} : vector<16x1xf32> -> vector<16x1xf32>
    %169 = vector.broadcast %168 : vector<16x1xf32> to vector<16x16xf32>
    %170 = arith.mulf %163, %169 : vector<16x16xf32>
    %cst_63 = arith.constant dense<0.000000e+00> : vector<16x4xf32>
    %171 = tpu.matmul %170, %139, %cst_63 {dimension_numbers = #tpu.dot_dimension_numbers<[1], [0], [0], [1], [0, 0, 1, 1], [], []>} : vector<16x16xf32>, vector<16x4xf32>, vector<16x4xf32> -> vector<16x4xf32>
    %172 = vector.extract_strided_slice %97 {offsets = [0, 4], sizes = [1, 4], strides = [1, 1]} : vector<1x8xf32> to vector<1x4xf32>
    %173 = vector.broadcast %172 : vector<1x4xf32> to vector<16x4xf32>
    %174 = arith.addf %171, %173 : vector<16x4xf32>
    %175 = arith.negf %174 : vector<16x4xf32>
    %176 = math.exp %175 : vector<16x4xf32>
    %cst_64 = arith.constant 1.000000e+00 : f32
    %177 = vector.broadcast %cst_64 : f32 to vector<16x4xf32>
    %178 = arith.addf %177, %176 : vector<16x4xf32>
    %179 = arith.divf %177, %178 : vector<16x4xf32>
    %180 = tpu.concatenate %138, %179 in 1 : vector<16x4xf32>, vector<16x4xf32> -> vector<16x8xf32>
    %c0_65 = arith.constant 0 : index
    %c0_66 = arith.constant 0 : index
    %181 = vector.load %arg14[%c0_65, %c0_66] : memref<16x8xf32, #tpu.memory_space<vmem>>, vector<16x8xf32>
    tpu.vector_store %arg14[%c0_65, %c0_66], %180 {strides = array<i32>} : memref<16x8xf32, #tpu.memory_space<vmem>>, vector<16x8xf32>,
    %c0_67 = arith.constant 0 : index
    %c0_68 = arith.constant 0 : index
    %182 = vector.load %arg10[%c0_67, %c0_68] : memref<8x10xf32, #tpu.memory_space<vmem>>, vector<8x10xf32>
    %cst_69 = arith.constant dense<0.000000e+00> : vector<16x10xf32>
    %183 = tpu.matmul %180, %182, %cst_69 {dimension_numbers = #tpu.dot_dimension_numbers<[1], [0], [0], [1], [0, 0, 1, 1], [], []>} : vector<16x8xf32>, vector<8x10xf32>, vector<16x10xf32> -> vector<16x10xf32>
    %c0_70 = arith.constant 0 : index
    %c0_71 = arith.constant 0 : index
    %184 = vector.load %arg11[%c0_70, %c0_71] : memref<1x10xf32, #tpu.memory_space<vmem>>, vector<1x10xf32>
    %185 = vector.broadcast %184 : vector<1x10xf32> to vector<16x10xf32>
    %186 = arith.addf %183, %185 : vector<16x10xf32>
    %cst_72 = arith.constant 0.000000e+00 : f32
    %187 = vector.broadcast %cst_72 : f32 to vector<16x10xf32>
    %188 = arith.maximumf %186, %187 : vector<16x10xf32>
    %c0_73 = arith.constant 0 : index
    %c0_74 = arith.constant 0 : index
    %189 = vector.load %arg12[%c0_73, %c0_74] : memref<10x1xf32, #tpu.memory_space<vmem>>, vector<10x1xf32>
    %cst_75 = arith.constant dense<0.000000e+00> : vector<16x1xf32>
    %190 = tpu.matmul %188, %189, %cst_75 {dimension_numbers = #tpu.dot_dimension_numbers<[1], [0], [0], [1], [0, 0, 1, 1], [], []>} : vector<16x10xf32>, vector<10x1xf32>, vector<16x1xf32> -> vector<16x1xf32>
    %c0_76 = arith.constant 0 : index
    %c0_77 = arith.constant 0 : index
    %191 = vector.load %arg13[%c0_76, %c0_77] : memref<1x1xf32, #tpu.memory_space<vmem>>, vector<1x1xf32>
    %192 = vector.broadcast %191 : vector<1x1xf32> to vector<16x1xf32>
    %193 = arith.addf %190, %192 : vector<16x1xf32>
    %c0_78 = arith.constant 0 : index
    %c0_79 = arith.constant 0 : index
    %194 = vector.load %arg15[%c0_78, %c0_79] : memref<16x1xf32, #tpu.memory_space<vmem>>, vector<16x1xf32>
    tpu.vector_store %arg15[%c0_78, %c0_79], %193 {strides = array<i32>} : memref<16x1xf32, #tpu.memory_space<vmem>>, vector<16x1xf32>,
    return
  }
}

</mosaic_0001>

<bundles_post_ra>
// kernel: tpu_custom_call.1
= control target key start
LH: loop header
LB: loop body
LE: loop exit
PB: predicated region body
PF: predicated region fallthrough
CT: control target
= control target key end

     0   :  { %vm62_vm0 = vcmask 64512   ;;  %v1677_v3 = vmov 0.0|0.0   ;;  %vm1678_vm1 = vmmov 0   ;;  %v1679_v4 = vmov 0.0   ;;  %s1681_s29 = smov 4   ;;  %s1986_s2 = inlined_call_operand.vmem [shape: f32[8,8], index: 2, kind: input, shape index: {}]   ;;  %s1987_s0 = inlined_call_operand.vmem [shape: f32[16,8], index: 0, kind: input, shape index: {}]   ;;  %s1988_s4 = inlined_call_operand.vmem [shape: f32[1,8], index: 4, kind: input, shape index: {}]   ;;  %s1989_s3 = inlined_call_operand.vmem [shape: f32[1,8], index: 3, kind: input, shape index: {}]   ;;  %s1990_s1 = inlined_call_operand.vmem [shape: s8[16,16], index: 1, kind: input, shape index: {}]   ;;  %s1991_s5 = inlined_call_operand.vmem [shape: f32[1,8], index: 5, kind: input, shape index: {}]   ;;  %s1992_s6 = inlined_call_operand.vmem [shape: f32[8,8], index: 6, kind: input, shape index: {}]   ;;  %s1993_s8 = inlined_call_operand.vmem [shape: f32[1,8], index: 8, kind: input, shape index: {}]   ;;  %s1994_s7 = inlined_call_operand.vmem [shape: f32[1,8], index: 7, kind: input, shape index: {}]   ;;  %s1995_s9 = inlined_call_operand.vmem [shape: f32[1,8], index: 9, kind: input, shape index: {}]   ;;  %s1996_s10 = inlined_call_operand.vmem [shape: f32[8,10], index: 10, kind: input, shape index: {}]   ;;  %s1997_s14 = inlined_call_operand.vmem [shape: f32[16,8], index: 14, kind: output, shape index: {0}]   ;;  %s1998_s12 = inlined_call_operand.vmem [shape: f32[10,1], index: 12, kind: input, shape index: {}]   ;;  %s1999_s13 = inlined_call_operand.<no memory space> [shape: f32[1,1], index: 13, kind: input, shape index: {}]   ;;  %s2000_s11 = inlined_call_operand.vmem [shape: f32[1,10], index: 11, kind: input, shape index: {}]   ;;  %s2001_s15 = inlined_call_operand.vmem [shape: f32[16,1], index: 15, kind: output, shape index: {1}]  }
   0x1   :  { %v61_v0 = vld [vmem:[%s1986_s2] sm:$0xff]  ;;  %v60_v2 = vld [vmem:[%s1987_s0 + $0x8] sm:$0xff]  ;;  %1559 = vmatprep.subr.bf16.mxu1 %v1677_v3  ;;  %1490 = vmatprep.mubr.msk.f32.mxu1 %vm1678_vm1, %v1679_v4  ;;  %vm155_vm2 = vcmask 31744   ;;  %v241_v16 = vlaneseq  ;;  %vm255_vm7 = vcmask 130048   ;;  %vm1303_vm15 = vcmask 1041408  }
   0x2   :  { %v59_v1 = vld [vmem:[%s1987_s0] sm:$0xff]  ;;  %1481 = vmatprep.subr.mxu0 %v61_v0  ;;  %vm1786_vm3 = vmpackc.low %vm155_vm2, %vm155_vm2 }
   0x3   :  { %1483 = vmatprep.mubr.msk.f32.mxu0 %vm62_vm0, %v59_v1  ;;  %1482 = vmatpush3.msra.mxu0 %v61_v0  ;;  %v1395_v5 = vld [vmem:[%s1988_s4] ss:$0 sm:$0xff]  ;;  %v242_v17 = vshrl.u32 %v241_v16, 7 }
   0x4   :  { %1484 = vmatmul.mubr.msk.f32.vlgmr.msra.gmra.mrb[0].mxu0 %vm62_vm0, %v60_v2  ;;  %v144_v15 = vld [vmem:[%s1989_s3] sm:$0x1] }
   0x5   :  { %v1437_v18 = vld [vmem:[%s1990_s1] sm:$0xf]   ;;  %v1811_v21 = vsub.s32 0, %v242_v17  ;;  %s1680_s1 = smov 124  }
   0x6   :  { %v1438_v20 = vunpack.c.0.s8 %v1437_v18  ;;  %v1439_v22 = vunpack.c.1.s8 %v1437_v18 }
   0x7   :  { %v398_v51 = vrot.slane %v144_v15, %v1811_v21 }
   0x8   :  { %v1813_v24 = vcvt.s32.f32 %v1438_v20  ;;  %v1816_v30 = vcvt.s32.f32 %v1439_v22 }
   0xa   :  { %vm57_vm4 = vcmp.gt.f32.partialorder %v1813_v24, 0.0  ;;  %vm58_vm8 = vcmp.gt.f32.partialorder %v1816_v30, 0.0 }
  0xd7   :  { %v1780_v6 = vpop.f32.mrb[0].mxu0 }
  0xd8   :  { %v1782_v7 = vpop.f32.mrb[1].mxu0  ;;  %v154_v13 = vmul.f32 %v1780_v6, %v1395_v5 }
  0xd9   :  { %v1603_v9 = vpack.i.bf16 %v1780_v6, %v1782_v7  ;;  %v1560_v10 = vpack.c.bf16 %v1780_v6, %v1782_v7  ;;  %v1795_v11 = vmul.f32 %v1395_v5, %v1782_v7 }
  0xda   :  { %v159_v14 = vsel %vm155_vm2, %v154_v13, 0.0 }
  0xdb   :  { %1562 = vmatpush3.bf16.xpose.msk.msra.mxu1 %vm1786_vm3, %v1560_v10  ;;  %1564 = vmatprep.subr.bf16.mxu0 %v1560_v10  ;;  %v156_v12 = vsel %vm155_vm2, %v1795_v11, 0.0 }
  0xdc   :  { %1566 = vmatpush3.bf16.msra.mxu0 %v1560_v10  ;;  %157 = vadd.xlane.f32.xlu0 %v156_v12 }
  0xdd   :  { %1567 = vmatprep.subr.bf16.mxu0 %v1677_v3 }
  0xe0   :  { %160 = vadd.xlane.f32.xlu0 %v159_v14 }
  0xe2   :  { %1491 = vmatmul.mubr.msk.f32.vlgmr.msra.gmra.mrb[0].mxu1 %vm155_vm2, %v144_v15 }
 0x169   :  { %v158_v19 = vpop.xlane.xlu0 %157 }
 0x16d   :  { %v161_v27 = vpop.xlane.xlu0 %160 }
 0x1b5   :  { %v237_v23 = vpop.f32.mrb[0].mxu1 }
 0x1b6   :  { %v244_v25 = vrot.slane %v237_v23, %v1811_v21  ;;  %v1492_v26 = vpop.f32.mrb[1].mxu1 }
 0x1b8   :  { %v245_v28 = vadd.f32 %v244_v25, %v158_v19  ;;  %v246_v29 = vadd.f32 %v244_v25, %v161_v27 }
 0x1ba   :  { %vm247_vm5 = vcmp.ge.f32.partialorder %v245_v28, 0.0  ;;  %v249_v31 = vmul.f32 0.2, %v245_v28  ;;  %vm248_vm6 = vcmp.ge.f32.partialorder %v246_v29, 0.0  ;;  %v250_v32 = vmul.f32 0.2, %v246_v29 }
 0x1bc   :  { %v251_v33 = vsel %vm247_vm5, %v245_v28, %v249_v31  ;;  %v252_v34 = vsel %vm248_vm6, %v246_v29, %v250_v32 }
 0x1bd   :  { %v253_v35 = vsel %vm57_vm4, %v251_v33, -1e+30  ;;  %v254_v37 = vsel %vm58_vm8, %v252_v34, -1e+30 }
 0x1be   :  { %v256_v36 = vsel %vm255_vm7, %v253_v35, -inf  ;;  %v259_v38 = vsel %vm255_vm7, %v254_v37, -inf }
 0x1bf   :  { %257 = vmax.xlane.f32.xlu1 %v256_v36 }
 0x1c3   :  { %260 = vmax.xlane.f32.xlu1 %v259_v38 }
 0x24c   :  { %v258_v39 = vpop.xlane.xlu1 %257 }
 0x24d   :  { %v262_v40 = vsub.f32 %v253_v35, %v258_v39 }
 0x24f   :  { %v264_v41 = vmul.f32 1.442695, %v262_v40  ;;  %v1399_v40 = vld [vmem:[%s1991_s5] ss:$0 sm:$0xff] }
 0x250   :  { %v261_v42 = vpop.xlane.xlu1 %260 }
 0x251   :  { %1613 = vpow2.f32 %v264_v41  ;;  %v263_v43 = vsub.f32 %v254_v37, %v261_v42 }
 0x253   :  { %v266_v44 = vmul.f32 1.442695, %v263_v43 }
 0x255   :  { %1615 = vpow2.f32 %v266_v44 }
 0x25b   :  { %v1614_v45 = vpop.eup %1613 }
 0x25c   :  { %v268_v46 = vsel %vm57_vm4, %v1614_v45, 0.0 }
 0x25d   :  { %v270_v47 = vsel %vm255_vm7, %v268_v46, 0.0 }
 0x25e   :  { %271 = vadd.xlane.f32.xlu0 %v270_v47 }
 0x25f   :  { %v1616_v48 = vpop.eup %1615 }
 0x260   :  { %v269_v49 = vsel %vm58_vm8, %v1616_v48, 0.0 }
 0x261   :  { %v273_v50 = vsel %vm255_vm7, %v269_v49, 0.0 }
 0x262   :  { %274 = vadd.xlane.f32.xlu1 %v273_v50 }
 0x273   :  { %399 = vrot.lane.b32.xlu1 %v398_v51, %s1680_s1 }
 0x274   :  { %1604 = vrot.lane.b32.xlu0 %v1603_v9, %s1680_s1 }
 0x277   :  { %383 = vrot.lane.b32.xlu1 %v1795_v11, %s1680_s1 }
 0x27b   :  { %385 = vrot.lane.b32.xlu1 %v154_v13, %s1680_s1 }
 0x2eb   :  { %v272_v52 = vpop.xlane.xlu0 %271 }
 0x2ec   :  { %v276_v53 = vmax.f32 %v272_v52, 1e-30 }
 0x2ee   :  { %1617 = vrcp.f32 %v276_v53 }
 0x2ef   :  { %v275_v54 = vpop.xlane.xlu1 %274  ;;  %v1605_v55 = vpop.permute.xlu0 %1604 }
 0x2f0   :  { %v277_v56 = vmax.f32 %v275_v54, 1e-30  ;;  %v1607_v57 = vunpack.i.h.bf16 %v1605_v55  ;;  %v1606_v58 = vunpack.i.l.bf16 %v1605_v55 }
 0x2f2   :  { %1619 = vrcp.f32 %v277_v56  ;;  %v1568_v59 = vpack.c.bf16 %v1607_v57, %v1606_v58 }
 0x2f3   :  { %v400_v60 = vpop.permute.xlu1 %399 }
 0x2f4   :  { %1572 = vmatprep.subr.bf16.mxu1 %v1568_v59 }
 0x2f5   :  { %1574 = vmatpush3.bf16.msra.mxu1 %v1568_v59 }
 0x2f7   :  { %v384_v61 = vpop.permute.xlu1 %383 }
 0x2f8   :  { %v1618_v62 = vpop.eup %1617  ;;  %v389_v63 = vsel %vm155_vm2, %v384_v61, 0.0 }
 0x2f9   :  { %390 = vadd.xlane.f32.xlu0 %v389_v63  ;;  %v280_v0 = vmul.f32 %v1618_v62, %v268_v46 }
 0x2fb   :  { %v386_v1 = vpop.permute.xlu1 %385  ;;  %1497 = vmatprep.mubr.msk.f32.mxu0 %vm255_vm7, %v280_v0 }
 0x2fc   :  { %v1620_v2 = vpop.eup %1619  ;;  %v392_v5 = vsel %vm155_vm2, %v386_v1, 0.0 }
 0x2fd   :  { %393 = vadd.xlane.f32.xlu1 %v392_v5  ;;  %v281_v6 = vmul.f32 %v1620_v2, %v269_v49 }
 0x2ff   :  { %1498 = vmatmul.mubr.msk.f32.vlgmr.msra.gmra.mrb[2].mxu0 %vm255_vm7, %v281_v6 }
 0x300   :  { %1570 = vmatpush3.bf16.xpose.msk.msra.mxu0 %vm1786_vm3, %v1568_v59  ;;  %1504 = vmatprep.mubr.msk.f32.mxu0 %vm1678_vm1, %v1679_v4  ;;  %v629_v59 = vld [vmem:[%s1992_s6] sm:$0xff] }
 0x301   :  { %1575 = vmatprep.subr.bf16.mxu0 %v1677_v3  ;;  %1514 = vmatprep.subr.mxu1 %v629_v59 }
 0x307   :  { %1505 = vmatmul.mubr.msk.f32.vlgmr.msra.gmra.mrb[4].mxu0 %vm155_vm2, %v400_v60 }
 0x308   :  { %1523 = vmatprep.mubr.msk.f32.mxu0 %vm1678_vm1, %v1679_v4 }
 0x386   :  { %v391_v13 = vpop.xlane.xlu0 %390 }
 0x38a   :  { %v394_v14 = vpop.xlane.xlu1 %393 }
 0x3d2   :  { %v1853_v7 = vpop.f32.mrb[2].mxu0 }
 0x3d3   :  { %v1855_v9 = vpop.f32.mrb[3].mxu0  ;;  %v366_v0 = vadd.f32 %v1853_v7, %v1399_v40 }
 0x3d4   :  { %v361_v63 = vadd.f32 %v1399_v40, %v1855_v9 }
 0x3d5   :  { %v1403_v2 = vmul.f32 -1.442695, %v366_v0 }
 0x3d6   :  { %v1402_v1 = vmul.f32 -1.442695, %v361_v63 }
 0x3da   :  { %v477_v10 = vpop.f32.mrb[4].mxu0 }
 0x3db   :  { %v484_v11 = vrot.slane %v477_v10, %v1811_v21  ;;  %v1506_v12 = vpop.f32.mrb[5].mxu0 }
 0x3dd   :  { %v485_v15 = vadd.f32 %v484_v11, %v391_v13  ;;  %v486_v16 = vadd.f32 %v484_v11, %v394_v14 }
 0x3df   :  { %vm487_vm9 = vcmp.ge.f32.partialorder %v485_v15, 0.0  ;;  %v489_v17 = vmul.f32 0.2, %v485_v15  ;;  %vm488_vm10 = vcmp.ge.f32.partialorder %v486_v16, 0.0  ;;  %v490_v18 = vmul.f32 0.2, %v486_v16 }
 0x3e1   :  { %v491_v19 = vsel %vm487_vm9, %v485_v15, %v489_v17  ;;  %v492_v20 = vsel %vm488_vm10, %v486_v16, %v490_v18  ;;  %v1413_v16 = vld [vmem:[%s1993_s8] ss:$0 sm:$0xff] }
 0x3e2   :  { %v493_v22 = vsel %vm57_vm4, %v491_v19, -1e+30  ;;  %v494_v25 = vsel %vm58_vm8, %v492_v20, -1e+30 }
 0x3e3   :  { %v495_v23 = vsel %vm255_vm7, %v493_v22, -inf  ;;  %v498_v26 = vsel %vm255_vm7, %v494_v25, -inf }
 0x3e4   :  { %496 = vmax.xlane.f32.xlu0 %v495_v23 }
 0x3e8   :  { %499 = vmax.xlane.f32.xlu0 %v498_v26 }
 0x471   :  { %v497_v27 = vpop.xlane.xlu0 %496 }
 0x472   :  { %v501_v28 = vsub.f32 %v493_v22, %v497_v27  ;;  %v711_v27 = vld [vmem:[%s1994_s7] sm:$0x1] }
 0x474   :  { %v503_v29 = vmul.f32 1.442695, %v501_v28 }
 0x475   :  { %v500_v31 = vpop.xlane.xlu0 %499 }
 0x476   :  { %1621 = vpow2.f32 %v503_v29  ;;  %v502_v32 = vsub.f32 %v494_v25, %v500_v31 }
 0x478   :  { %v505_v33 = vmul.f32 1.442695, %v502_v32 }
 0x47a   :  { %1623 = vpow2.f32 %v505_v33 }
 0x480   :  { %v1622_v34 = vpop.eup %1621 }
 0x481   :  { %v507_v35 = vsel %vm57_vm4, %v1622_v34, 0.0 }
 0x482   :  { %v509_v36 = vsel %vm255_vm7, %v507_v35, 0.0 }
 0x483   :  { %510 = vadd.xlane.f32.xlu0 %v509_v36 }
 0x484   :  { %v1624_v37 = vpop.eup %1623 }
 0x485   :  { %v508_v38 = vsel %vm58_vm8, %v1624_v37, 0.0 }
 0x486   :  { %v512_v39 = vsel %vm255_vm7, %v508_v38, 0.0 }
 0x487   :  { %513 = vadd.xlane.f32.xlu1 %v512_v39 }
 0x499   :  { %523 = vrot.lane.b32.xlu0 %v1399_v40, %s1680_s1 }
 0x510   :  { %v511_v41 = vpop.xlane.xlu0 %510 }
 0x511   :  { %v515_v42 = vmax.f32 %v511_v41, 1e-30 }
 0x513   :  { %1625 = vrcp.f32 %v515_v42 }
 0x514   :  { %v514_v43 = vpop.xlane.xlu1 %513  ;;  %v524_v49 = vpop.permute.xlu0 %523 }
 0x515   :  { %v516_v44 = vmax.f32 %v514_v43, 1e-30 }
 0x517   :  { %1627 = vrcp.f32 %v516_v44 }
 0x51d   :  { %v1626_v45 = vpop.eup %1625 }
 0x51e   :  { %v519_v46 = vmul.f32 %v1626_v45, %v507_v35 }
 0x520   :  { %1511 = vmatprep.mubr.msk.f32.mxu1 %vm255_vm7, %v519_v46 }
 0x521   :  { %v1628_v47 = vpop.eup %1627 }
 0x522   :  { %v520_v48 = vmul.f32 %v1628_v47, %v508_v38 }
 0x524   :  { %1512 = vmatmul.mubr.msk.f32.vlgmr.msra.gmra.mrb[2].mxu1 %vm255_vm7, %v520_v48 }
 0x525   :  { %1515 = vmatpush3.msra.mxu1 %v629_v59 }
 0x5f7   :  { %v1513_v50 = vpop.f32.mrb[2].mxu1 }
 0x5f8   :  { %v604_v51 = vadd.f32 %v1513_v50, %v524_v49  ;;  %v598_v52 = vpop.f32.mrb[3].mxu1 }
 0x5f9   :  { %v599_v53 = vadd.f32 %v598_v52, %v524_v49 }
 0x5fa   :  { %v1410_v54 = vmul.f32 -1.442695, %v604_v51 }
 0x5fb   :  { %v1409_v55 = vmul.f32 -1.442695, %v599_v53 }
 0x5fc   :  { %1629 = vpow2.f32 %v1410_v54 }
 0x5fd   :  { %1631 = vpow2.f32 %v1409_v55  ;;  %v963_v55 = vrot.slane %v711_v27, %v1811_v21 }
 0x606   :  { %v1630_v56 = vpop.eup %1629 }
 0x607   :  { %v1632_v57 = vpop.eup %1631  ;;  %v614_v60 = vadd.f32 1.0, %v1630_v56 }
 0x608   :  { %v613_v58 = vadd.f32 1.0, %v1632_v57 }
 0x60a   :  { %1633 = vrcp.f32 %v613_v58 }
 0x60b   :  { %1635 = vrcp.f32 %v614_v60 }
 0x60c   :  { %1637 = vpow2.f32 %v1402_v1 }
 0x60d   :  { %1639 = vpow2.f32 %v1403_v2 }
 0x614   :  { %v1634_v61 = vpop.eup %1633 }
 0x615   :  { %621 = vrot.lane.b32.xlu1 %v1634_v61, %s1681_s29  ;;  %v1636_v62 = vpop.eup %1635 }
 0x616   :  { %v1638_v5 = vpop.eup %1637 }
 0x617   :  { %v375_v6 = vadd.f32 1.0, %v1638_v5  ;;  %v1640_v10 = vpop.eup %1639 }
 0x618   :  { %v376_v11 = vadd.f32 1.0, %v1640_v10 }
 0x619   :  { %623 = vrot.lane.b32.xlu1 %v1636_v62, %s1681_s29  ;;  %1641 = vrcp.f32 %v375_v6 }
 0x61a   :  { %1643 = vrcp.f32 %v376_v11 }
 0x623   :  { %v1642_v12 = vpop.eup %1641 }
 0x624   :  { %v1644_v15 = vpop.eup %1643 }
 0x687   :  { %v622_v13 = vpop.permute.xlu1 %621 }
 0x688   :  { %v627_v14 = vsel %vm155_vm2, %v1642_v12, %v622_v13 }
 0x689   :  { %1516 = vmatprep.mubr.msk.f32.mxu1 %vm62_vm0, %v627_v14 }
 0x68b   :  { %v624_v9 = vpop.permute.xlu1 %623 }
 0x68c   :  { %v628_v7 = vsel %vm155_vm2, %v1644_v15, %v624_v9 }
 0x68d   :  { %1517 = vmatmul.mubr.msk.f32.vlgmr.msra.gmra.mrb[4].mxu1 %vm62_vm0, %v628_v7 }
 0x760   :  { %v1518_v17 = vpop.f32.mrb[4].mxu1 }
 0x761   :  { %v702_v18 = vpop.f32.mrb[5].mxu1  ;;  %v721_v19 = vmul.f32 %v1518_v17, %v1413_v16 }
 0x762   :  { %v1608_v20 = vpack.i.bf16 %v1518_v17, %v702_v18  ;;  %v1576_v22 = vpack.c.bf16 %v1518_v17, %v702_v18  ;;  %v720_v23 = vmul.f32 %v1413_v16, %v702_v18 }
 0x763   :  { %v725_v25 = vsel %vm155_vm2, %v721_v19, 0.0 }
 0x764   :  { %726 = vadd.xlane.f32.xlu0 %v725_v25  ;;  %1578 = vmatpush3.bf16.xpose.msk.msra.mxu0 %vm1786_vm3, %v1576_v22  ;;  %v722_v26 = vsel %vm155_vm2, %v720_v23, 0.0 }
 0x765   :  { %1580 = vmatprep.subr.bf16.mxu1 %v1576_v22  ;;  %723 = vadd.xlane.f32.xlu1 %v722_v26 }
 0x766   :  { %1582 = vmatpush3.bf16.msra.mxu1 %v1576_v22 }
 0x767   :  { %1583 = vmatprep.subr.bf16.mxu1 %v1677_v3 }
 0x76b   :  { %1524 = vmatmul.mubr.msk.f32.vlgmr.msra.gmra.mrb[6].mxu0 %vm155_vm2, %v711_v27 }
 0x7f1   :  { %v727_v32 = vpop.xlane.xlu0 %726 }
 0x7f2   :  { %v724_v33 = vpop.xlane.xlu1 %723 }
 0x83e   :  { %v803_v28 = vpop.f32.mrb[6].mxu0 }
 0x83f   :  { %v810_v29 = vrot.slane %v803_v28, %v1811_v21  ;;  %v1525_v31 = vpop.f32.mrb[7].mxu0 }
 0x841   :  { %v811_v34 = vadd.f32 %v810_v29, %v724_v33  ;;  %v812_v35 = vadd.f32 %v810_v29, %v727_v32 }
 0x843   :  { %vm813_vm11 = vcmp.ge.f32.partialorder %v811_v34, 0.0  ;;  %v815_v36 = vmul.f32 0.2, %v811_v34  ;;  %vm814_vm12 = vcmp.ge.f32.partialorder %v812_v35, 0.0  ;;  %v816_v37 = vmul.f32 0.2, %v812_v35 }
 0x845   :  { %v817_v38 = vsel %vm813_vm11, %v811_v34, %v815_v36  ;;  %v818_v3 = vsel %vm814_vm12, %v812_v35, %v816_v37 }
 0x846   :  { %v819_v39 = vsel %vm57_vm4, %v817_v38, -1e+30  ;;  %v820_v41 = vsel %vm58_vm8, %v818_v3, -1e+30 }
 0x847   :  { %v821_v40 = vsel %vm255_vm7, %v819_v39, -inf  ;;  %v824_v42 = vsel %vm255_vm7, %v820_v41, -inf }
 0x848   :  { %822 = vmax.xlane.f32.xlu0 %v821_v40  ;;  %v1417_v40 = vld [vmem:[%s1995_s9] ss:$0 sm:$0xff] }
 0x84c   :  { %825 = vmax.xlane.f32.xlu0 %v824_v42 }
 0x8d5   :  { %v823_v43 = vpop.xlane.xlu0 %822 }
 0x8d6   :  { %v827_v44 = vsub.f32 %v819_v39, %v823_v43 }
 0x8d8   :  { %v829_v45 = vmul.f32 1.442695, %v827_v44 }
 0x8d9   :  { %v826_v46 = vpop.xlane.xlu0 %825 }
 0x8da   :  { %1645 = vpow2.f32 %v829_v45  ;;  %v828_v47 = vsub.f32 %v820_v41, %v826_v46 }
 0x8dc   :  { %v831_v48 = vmul.f32 1.442695, %v828_v47  ;;  %v1196_v47 = vld [vmem:[%s1996_s10] sm:$0xff] }
 0x8de   :  { %1647 = vpow2.f32 %v831_v48 }
 0x8e4   :  { %v1646_v49 = vpop.eup %1645 }
 0x8e5   :  { %v833_v50 = vsel %vm57_vm4, %v1646_v49, 0.0 }
 0x8e6   :  { %v835_v51 = vsel %vm255_vm7, %v833_v50, 0.0 }
 0x8e7   :  { %836 = vadd.xlane.f32.xlu1 %v835_v51 }
 0x8e8   :  { %v1648_v52 = vpop.eup %1647 }
 0x8e9   :  { %v834_v53 = vsel %vm58_vm8, %v1648_v52, 0.0 }
 0x8ea   :  { %v838_v54 = vsel %vm255_vm7, %v834_v53, 0.0 }
 0x8eb   :  { %839 = vadd.xlane.f32.xlu0 %v838_v54 }
 0x8f8   :  { %1609 = vrot.lane.b32.xlu1 %v1608_v20, %s1680_s1 }
 0x8fc   :  { %948 = vrot.lane.b32.xlu1 %v720_v23, %s1680_s1 }
 0x900   :  { %950 = vrot.lane.b32.xlu1 %v721_v19, %s1680_s1 }
 0x901   :  { %964 = vrot.lane.b32.xlu0 %v963_v55, %s1680_s1 }
 0x974   :  { %v837_v56 = vpop.xlane.xlu1 %836 }
 0x975   :  { %v841_v57 = vmax.f32 %v837_v56, 1e-30 }
 0x977   :  { %1649 = vrcp.f32 %v841_v57 }
 0x978   :  { %v1610_v58 = vpop.permute.xlu1 %1609  ;;  %v840_v59 = vpop.xlane.xlu0 %839 }
 0x979   :  { %v1612_v60 = vunpack.i.h.bf16 %v1610_v58  ;;  %v1611_v61 = vunpack.i.l.bf16 %v1610_v58  ;;  %v842_v62 = vmax.f32 %v840_v59, 1e-30 }
 0x97b   :  { %v1584_v63 = vpack.c.bf16 %v1612_v60, %v1611_v61  ;;  %1651 = vrcp.f32 %v842_v62 }
 0x97c   :  { %v949_v0 = vpop.permute.xlu1 %948  ;;  %v965_v13 = vpop.permute.xlu0 %964 }
 0x97d   :  { %1588 = vmatprep.subr.bf16.mxu0 %v1584_v63  ;;  %v954_v1 = vsel %vm155_vm2, %v949_v0, 0.0 }
 0x97e   :  { %955 = vadd.xlane.f32.xlu1 %v954_v1  ;;  %1590 = vmatpush3.bf16.msra.mxu0 %v1584_v63 }
 0x97f   :  { %1547 = vmatprep.subr.mxu0 %v1196_v47 }
 0x980   :  { %v951_v2 = vpop.permute.xlu1 %950 }
 0x981   :  { %v1650_v5 = vpop.eup %1649  ;;  %v957_v6 = vsel %vm155_vm2, %v951_v2, 0.0 }
 0x982   :  { %958 = vadd.xlane.f32.xlu0 %v957_v6  ;;  %v845_v10 = vmul.f32 %v1650_v5, %v833_v50 }
 0x984   :  { %1530 = vmatprep.mubr.msk.f32.mxu1 %vm255_vm7, %v845_v10 }
 0x985   :  { %v1652_v11 = vpop.eup %1651 }
 0x986   :  { %v846_v12 = vmul.f32 %v1652_v11, %v834_v53 }
 0x988   :  { %1531 = vmatmul.mubr.msk.f32.vlgmr.msra.gmra.mrb[6].mxu1 %vm255_vm7, %v846_v12 }
 0x989   :  { %1586 = vmatpush3.bf16.xpose.msk.msra.mxu1 %vm1786_vm3, %v1584_v63  ;;  %1537 = vmatprep.mubr.msk.f32.mxu1 %vm1678_vm1, %v1679_v4  ;;  %vm1682_vm1 = vmmov 1   ;;  %vm1382_vm3 = vcmask 7168  }
 0x990   :  { %1538 = vmatmul.mubr.msk.f32.vlgmr.msra.gmra.mrb[8].mxu1 %vm155_vm2, %v965_v13 }
 0xa0b   :  { %v956_v17 = vpop.xlane.xlu1 %955 }
 0xa0f   :  { %v959_v18 = vpop.xlane.xlu0 %958 }
 0xa5b   :  { %v1926_v14 = vpop.f32.mrb[6].mxu1 }
 0xa5c   :  { %v1928_v15 = vpop.f32.mrb[7].mxu1  ;;  %v931_v61 = vadd.f32 %v1926_v14, %v1417_v40 }
 0xa5d   :  { %v926_v62 = vadd.f32 %v1417_v40, %v1928_v15  ;;  %v1287_v15 = vld [vmem:[%s1998_s12] sm:$0xff] }
 0xa5e   :  { %v1421_v63 = vmul.f32 -1.442695, %v931_v61 }
 0xa5f   :  { %v1420_v0 = vmul.f32 -1.442695, %v926_v62 }
 0xa63   :  { %v1042_v9 = vpop.f32.mrb[8].mxu1 }
 0xa64   :  { %v1049_v7 = vrot.slane %v1042_v9, %v1811_v21  ;;  %v1539_v16 = vpop.f32.mrb[9].mxu1 }
 0xa66   :  { %v1050_v19 = vadd.f32 %v1049_v7, %v956_v17  ;;  %v1051_v20 = vadd.f32 %v1049_v7, %v959_v18  ;;  %v1288_v7 = vld [vmem:[%s1998_s12 + $0x8] sm:$0x3]  ;;  %v21_v17 = vstv %s1999_s13  ;;  %v1429_v18 = vld [vmem:[%s2000_s11] ss:$0 sm:$0xff] }
 0xa67   :  { %v1591_v16 = vpack.c.bf16 %v1288_v7, %v1287_v15  ;;  %22 = vst [vmem:[#allocation2] sm:$0x1] %v21_v17 }
 0xa68   :  { %vm1052_vm13 = vcmp.ge.f32.partialorder %v1050_v19, 0.0  ;;  %v1054_v8 = vmul.f32 0.2, %v1050_v19  ;;  %vm1053_vm14 = vcmp.ge.f32.partialorder %v1051_v20, 0.0  ;;  %v1055_v22 = vmul.f32 0.2, %v1051_v20 }
 0xa6a   :  { %v1056_v4 = vsel %vm1052_vm13, %v1050_v19, %v1054_v8  ;;  %v1057_v23 = vsel %vm1053_vm14, %v1051_v20, %v1055_v22 }
 0xa6b   :  { %v1058_v25 = vsel %vm57_vm4, %v1056_v4, -1e+30  ;;  %v1059_v21 = vsel %vm58_vm8, %v1057_v23, -1e+30 }
 0xa6c   :  { %v1060_v26 = vsel %vm255_vm7, %v1058_v25, -inf  ;;  %v1063_v27 = vsel %vm255_vm7, %v1059_v21, -inf }
 0xa6d   :  { %1061 = vmax.xlane.f32.xlu0 %v1060_v26 }
 0xa71   :  { %1064 = vmax.xlane.f32.xlu0 %v1063_v27 }
 0xafa   :  { %v1062_v28 = vpop.xlane.xlu0 %1061 }
 0xafb   :  { %v1066_v29 = vsub.f32 %v1058_v25, %v1062_v28  ;;  %v1432_v25 = vld [vmem:[#allocation2] ss:$0 sm:$0xff] }
 0xafd   :  { %v1068_v31 = vmul.f32 1.442695, %v1066_v29 }
 0xafe   :  { %v1065_v32 = vpop.xlane.xlu0 %1064 }
 0xaff   :  { %1653 = vpow2.f32 %v1068_v31  ;;  %v1067_v33 = vsub.f32 %v1059_v21, %v1065_v32 }
 0xb01   :  { %v1070_v34 = vmul.f32 1.442695, %v1067_v33 }
 0xb03   :  { %1655 = vpow2.f32 %v1070_v34 }
 0xb09   :  { %v1654_v35 = vpop.eup %1653 }
 0xb0a   :  { %v1072_v36 = vsel %vm57_vm4, %v1654_v35, 0.0 }
 0xb0b   :  { %v1074_v37 = vsel %vm255_vm7, %v1072_v36, 0.0 }
 0xb0c   :  { %1075 = vadd.xlane.f32.xlu1 %v1074_v37 }
 0xb0d   :  { %v1656_v38 = vpop.eup %1655 }
 0xb0e   :  { %v1073_v3 = vsel %vm58_vm8, %v1656_v38, 0.0 }
 0xb0f   :  { %v1077_v39 = vsel %vm255_vm7, %v1073_v3, 0.0 }
 0xb10   :  { %1078 = vadd.xlane.f32.xlu0 %v1077_v39 }
 0xb1d   :  { %1088 = vrot.lane.b32.xlu1 %v1417_v40, %s1680_s1 }
 0xb99   :  { %v1076_v41 = vpop.xlane.xlu1 %1075 }
 0xb9a   :  { %v1080_v42 = vmax.f32 %v1076_v41, 1e-30 }
 0xb9c   :  { %1657 = vrcp.f32 %v1080_v42 }
 0xb9d   :  { %v1079_v24 = vpop.xlane.xlu0 %1078  ;;  %v1089_v48 = vpop.permute.xlu1 %1088 }
 0xb9e   :  { %v1081_v43 = vmax.f32 %v1079_v24, 1e-30 }
 0xba0   :  { %1659 = vrcp.f32 %v1081_v43 }
 0xba6   :  { %v1658_v44 = vpop.eup %1657 }
 0xba7   :  { %v1084_v45 = vmul.f32 %v1658_v44, %v1072_v36 }
 0xba9   :  { %1544 = vmatprep.mubr.msk.f32.mxu0 %vm255_vm7, %v1084_v45 }
 0xbaa   :  { %v1660_v30 = vpop.eup %1659 }
 0xbab   :  { %v1085_v46 = vmul.f32 %v1660_v30, %v1073_v3 }
 0xbad   :  { %1545 = vmatmul.mubr.msk.f32.vlgmr.msra.gmra.mrb[8].mxu0 %vm255_vm7, %v1085_v46 }
 0xbae   :  { %1548 = vmatpush3.msra.mxu0 %v1196_v47 }
 0xc80   :  { %v1546_v49 = vpop.f32.mrb[8].mxu0 }
 0xc81   :  { %v1169_v50 = vadd.f32 %v1546_v49, %v1089_v48  ;;  %v1163_v51 = vpop.f32.mrb[9].mxu0 }
 0xc82   :  { %v1164_v52 = vadd.f32 %v1163_v51, %v1089_v48 }
 0xc83   :  { %v1428_v53 = vmul.f32 -1.442695, %v1169_v50 }
 0xc84   :  { %v1427_v54 = vmul.f32 -1.442695, %v1164_v52 }
 0xc85   :  { %1661 = vpow2.f32 %v1428_v53 }
 0xc86   :  { %1663 = vpow2.f32 %v1427_v54 }
 0xc8f   :  { %v1662_v55 = vpop.eup %1661 }
 0xc90   :  { %v1664_v56 = vpop.eup %1663  ;;  %v1179_v57 = vadd.f32 1.0, %v1662_v55 }
 0xc91   :  { %v1178_v58 = vadd.f32 1.0, %v1664_v56 }
 0xc92   :  { %1665 = vrcp.f32 %v1179_v57 }
 0xc93   :  { %1667 = vrcp.f32 %v1178_v58 }
 0xc94   :  { %1669 = vpow2.f32 %v1421_v63 }
 0xc95   :  { %1671 = vpow2.f32 %v1420_v0 }
 0xc9c   :  { %v1666_v59 = vpop.eup %1665 }
 0xc9d   :  { %v1668_v60 = vpop.eup %1667  ;;  %1188 = vrot.lane.b32.xlu1 %v1666_v59, %s1681_s29 }
 0xc9e   :  { %1186 = vrot.lane.b32.xlu0 %v1668_v60, %s1681_s29  ;;  %v1670_v1 = vpop.eup %1669 }
 0xc9f   :  { %v1672_v2 = vpop.eup %1671  ;;  %v941_v5 = vadd.f32 1.0, %v1670_v1 }
 0xca0   :  { %v940_v6 = vadd.f32 1.0, %v1672_v2 }
 0xca1   :  { %1673 = vrcp.f32 %v941_v5 }
 0xca2   :  { %1675 = vrcp.f32 %v940_v6 }
 0xcab   :  { %v1674_v10 = vpop.eup %1673 }
 0xcac   :  { %v1676_v12 = vpop.eup %1675 }
 0xd0f   :  { %v1189_v11 = vpop.permute.xlu1 %1188 }
 0xd10   :  { %v1193_v13 = vsel %vm155_vm2, %v1674_v10, %v1189_v11  ;;  %v1187_v9 = vpop.permute.xlu0 %1186 }
 0xd11   :  { %1195 = vst.msk [vmem:[%s1997_s14 + $0x8] sm:$0xff] %vm62_vm0, %v1193_v13  ;;  %v1192_v14 = vsel %vm155_vm2, %v1676_v12, %v1187_v9  ;;  %vm1592_vm2 = vmpackc.low %vm1303_vm15, %vm1682_vm1 }
 0xd12   :  { %1194 = vst.msk [vmem:[%s1997_s14] sm:$0xff] %vm62_vm0, %v1192_v14  ;;  %1549 = vmatprep.mubr.msk.f32.mxu0 %vm62_vm0, %v1192_v14  ;;  %1593 = vmatprep.subr.msk.bf16.mxu1 %vm1592_vm2, %v1591_v16 }
 0xd13   :  { %1550 = vmatmul.mubr.msk.f32.vlgmr.msra.gmra.mrb[10].mxu0 %vm62_vm0, %v1193_v13  ;;  %1596 = vmatpush3.bf16.msk.msra.mxu1 %vm1592_vm2, %v1591_v16  ;;  %vm1296_vm0 = vcmask 80896  }
 0xde6   :  { %v1551_v19 = vpop.f32.mrb[10].mxu0 }
 0xde7   :  { %v1282_v20 = vadd.f32 %v1551_v19, %v1429_v18  ;;  %v1276_v8 = vpop.f32.mrb[11].mxu0 }
 0xde8   :  { %v1277_v22 = vadd.f32 %v1429_v18, %v1276_v8 }
 0xde9   :  { %v1286_v23 = vmax.f32 %v1282_v20, 0.0 }
 0xdea   :  { %v1285_v4 = vmax.f32 %v1277_v22, 0.0 }
 0xdec   :  { %1556 = vmatprep.mubr.msk.f32.mxu1 %vm1296_vm0, %v1285_v4 }
 0xded   :  { %1557 = vmatmul.mubr.msk.f32.vlgmr.msra.gmra.mrb[10].mxu1 %vm1296_vm0, %v1286_v23 }
 0xec0   :  { %v1558_v26 = vpop.f32.mrb[10].mxu1 }
 0xec1   :  { %v1379_v21 = vadd.f32 %v1558_v26, %v1432_v25  ;;  %v1373_v27 = vpop.f32.mrb[11].mxu1 }
 0xec2   :  { %v1374_v28 = vadd.f32 %v1432_v25, %v1373_v27 }
 0xec3   :  { %1384 = vst.msk [vmem:[%s2001_s15 + $0x8] sm:$0xff] %vm1382_vm3, %v1379_v21 }
 0xec4   :  { %1383 = vst.msk [vmem:[%s2001_s15] sm:$0xff] %vm1382_vm3, %v1374_v28 }

</bundles_post_ra>
